<compile_context>
chip_gen: v7x
topology: tpu7x:2x2x1
jax: 0.10.0
libtpu: 0.0.40
codegen_flags: <defaults>
</compile_context>

<pallas_src>
import jax
import jax.numpy as jnp
from jax.experimental import pallas as pl
from jax.experimental.pallas import tpu as pltpu


# ---------------------------------------------------------------------------
# Kernel 1: adaLN modulation head (tiny, one grid point).
#   mod = SiLU(c) @ W_ada + b_ada          -> (B, 2H), split into shift/scale
#   (as mod.reshape(B, 2, H)) in the wrapper.
# ---------------------------------------------------------------------------
def _adaln_kernel(c_ref, w_ref, b_ref, mod_ref):
    cf = c_ref[...].astype(jnp.float32)
    silu = (cf * jax.nn.sigmoid(cf)).astype(c_ref.dtype)      # SiLU on EUP
    mod = jnp.dot(silu, w_ref[...], preferred_element_type=jnp.float32)
    mod_ref[...] = (mod + b_ref[...].astype(jnp.float32)).astype(mod_ref.dtype)


# ---------------------------------------------------------------------------
# Kernel 2: LayerNorm (no affine, eps=1e-6) + modulate + final linear.
# (batch, seq-tile) grid; x / out tiles double-buffered by the pipeline,
# modulation + weights resident (constant index maps, single-buffered).
# ---------------------------------------------------------------------------
def _final_layer_kernel(x_ref, mod_ref, w_ref, b_ref, o_ref):
    x = x_ref[...]                                   # (T_TILE, H), native dtype
    xf = x.astype(jnp.float32)

    # LayerNorm over hidden dim with f32 statistics.
    mean = jnp.mean(xf, axis=-1, keepdims=True)
    xc = xf - mean
    var = jnp.mean(xc * xc, axis=-1, keepdims=True)
    xn = xc * jax.lax.rsqrt(var + 1e-6)              # (T_TILE, H) f32

    # modulate: x * (1 + scale) + shift  (mod rows: 0 -> shift, 1 -> scale).
    mod = mod_ref[...].astype(jnp.float32)           # (2, H)
    shift = mod[0:1, :]
    scale = mod[1:2, :]
    xm = xn * (1.0 + scale) + shift

    # Final projection on the MXU; operands in the input dtype (bf16-friendly).
    out = jnp.dot(xm.astype(x.dtype), w_ref[...],
                  preferred_element_type=jnp.float32)
    out = out + b_ref[...].astype(jnp.float32)
    o_ref[...] = out.astype(o_ref.dtype)             # (T_TILE, O_pad)


def _round_up(n: int, m: int) -> int:
    return ((n + m - 1) // m) * m


_VMEM_BUDGET = 24 << 20          # leaves headroom under v7x's 64 MiB physical VMEM


def _pick_t_tile(T: int, B: int, H: int, O_pad: int, itemsize: int) -> int:
    """Largest sequence tile that fits the VMEM budget; prefers divisors of T and
    keeping >= ~4 grid steps for megacore sharding (v7x)."""
    if T < 8:
        return T
    resident = (H * O_pad + O_pad + 2 * H) * itemsize          # W, b, mod (1-buffered)
    cands = [c for c in (2048, 1024, 512, 256, 128, 64, 32, 16, 8)
             if c <= T and resident + 2 * c * (H + O_pad) * itemsize <= _VMEM_BUDGET]
    if not cands:
        return 8
    for c in cands:                                   # divides T and >= 4 grid steps
        if T % c == 0 and B * (T // c) >= 4:
            return c
    for c in cands:                                   # divides T
        if T % c == 0:
            return c
    for c in cands:                                   # >= 4 grid steps (T padded)
        if B * (-(-T // c)) >= 4:
            return c
    return cands[0]


def final_layer(x, c, w_ada, b_ada, w_lin, b_lin, *, return_padded_features=False):
    """DiT FinalLayer forward.

    x: (B, T, H), c: (B, H).
    w_ada: (H, 2H), b_ada: (1, 2H), w_lin: (H, O), b_lin: (1, O)
    (nn.Linear weights stored transposed as (in_dim, out_dim)).
    Returns (B, T, O), or (B, T, O_pad) lane-padded output if
    return_padded_features=True (lets the consumer fuse the unpad and skip an
    HBM copy).
    """
    B, T, H = x.shape
    O = w_lin.shape[1]
    itemsize = jnp.dtype(x.dtype).itemsize

    # ---- adaLN head: one unsplit dot, modulation in x.dtype ----
    vmem_spec = pl.BlockSpec(memory_space=pltpu.MemorySpace.VMEM)
    mod = pl.pallas_call(
        _adaln_kernel,
        out_shape=jax.ShapeDtypeStruct((B, 2 * H), x.dtype),
        in_specs=[vmem_spec, vmem_spec, vmem_spec],
        out_specs=vmem_spec,
    )(c, w_ada, b_ada)
    mod = mod.reshape(B, 2, H)            # row 0 = shift, row 1 = scale (tiny)

    # ---- lane-dense output: pad O up to a multiple of 128 lanes (not 256) ----
    O_pad = _round_up(O, 128)
    if O_pad != O:
        w_lin_p = jnp.pad(w_lin, ((0, 0), (0, O_pad - O)))
        b_lin_p = jnp.pad(b_lin, ((0, 0), (0, O_pad - O)))
    else:
        w_lin_p, b_lin_p = w_lin, b_lin

    # ---- sequence tiling (pad T instead of one giant full-T block) ----
    t_tile = _pick_t_tile(T, B, H, O_pad, itemsize)
    T_pad = _round_up(T, t_tile)
    x_in = jnp.pad(x, ((0, 0), (0, T_pad - T), (0, 0))) if T_pad != T else x
    grid = (B, T_pad // t_tile)

    # VMEM provisioning: 2x (x + out) tiles + single-buffered residents + slack.
    resident = (H * O_pad + O_pad + 2 * H) * itemsize
    tiles = 2 * t_tile * (H + O_pad) * itemsize
    vmem_limit = max(32 << 20, min(int(1.5 * (resident + tiles)) + (2 << 20), 56 << 20))

    single = pl.Buffered(1)               # t-invariant operands: no double-buffer
    out_padded = pl.pallas_call(
        _final_layer_kernel,
        out_shape=jax.ShapeDtypeStruct((B, T_pad, O_pad), x.dtype),
        grid=grid,
        in_specs=[
            pl.BlockSpec((pl.Squeezed(), t_tile, H), lambda b, t: (b, t, 0)),
            pl.BlockSpec((pl.Squeezed(), 2, H), lambda b, t: (b, 0, 0),
                         pipeline_mode=single),
            pl.BlockSpec((H, O_pad), lambda b, t: (0, 0), pipeline_mode=single),
            pl.BlockSpec((1, O_pad), lambda b, t: (0, 0), pipeline_mode=single),
        ],
        out_specs=pl.BlockSpec((pl.Squeezed(), t_tile, O_pad),
                               lambda b, t: (b, t, 0)),
        compiler_params=pltpu.CompilerParams(
            dimension_semantics=("parallel", "parallel"),
            vmem_limit_bytes=vmem_limit),
    )(x_in, mod, w_lin_p, b_lin_p)

    if return_padded_features:
        return out_padded[:, :T, :] if T_pad != T else out_padded
    if T_pad != T or O_pad != O:
        return out_padded[:, :T, :O]
    return out_padded


def reference(x, c, w_ada, b_ada, w_lin, b_lin):
    silu_c = c * jax.nn.sigmoid(c)
    ada = silu_c @ w_ada + b_ada[0]
    H = x.shape[-1]
    shift, scale = ada[:, :H], ada[:, H:]
    mean = jnp.mean(x, axis=-1, keepdims=True)
    var = jnp.mean((x - mean) ** 2, axis=-1, keepdims=True)
    xn = (x - mean) / jnp.sqrt(var + 1e-6)
    xm = xn * (1.0 + scale[:, None, :]) + shift[:, None, :]
    return xm @ w_lin + b_lin[0]


if __name__ == "__main__":
    B, T, H, O = 2, 8, 32, 16   # batch, seq, hidden_size, output_dim

    key = jax.random.PRNGKey(0)
    kx, kc, k1, k2, k3, k4 = jax.random.split(key, 6)

    x = jax.random.normal(kx, (B, T, H), dtype=jnp.float32)
    c = jax.random.normal(kc, (B, H), dtype=jnp.float32)

    # nn.Linear weights stored transposed as (in_dim, out_dim).
    w_ada = jax.random.normal(k1, (H, 2 * H), dtype=jnp.float32) * 0.02
    b_ada = jax.random.normal(k2, (1, 2 * H), dtype=jnp.float32) * 0.02
    w_lin = jax.random.normal(k3, (H, O), dtype=jnp.float32) * 0.02
    b_lin = jax.random.normal(k4, (1, O), dtype=jnp.float32) * 0.02

    out = final_layer(x, c, w_ada, b_ada, w_lin, b_lin)
    out = jax.block_until_ready(out)

    ref = reference(x, c, w_ada, b_ada, w_lin, b_lin)
    assert out.shape == (B, T, O)
    err = jnp.max(jnp.abs(out - ref))
    assert jnp.allclose(out, ref, atol=1e-4, rtol=1e-4), f"max err {err}"

    print("KERNEL_OK")
</pallas_src>

<mosaic_0001>
module attributes {stable_mosaic.version = 11 : i64} {
  func.func @_adaln_kernel(%arg0: memref<2x32xf32, #tpu.memory_space<vmem>>, %arg1: memref<32x64xf32, #tpu.memory_space<vmem>>, %arg2: memref<1x64xf32, #tpu.memory_space<vmem>>, %arg3: memref<2x64xf32, #tpu.memory_space<vmem>>) attributes {dimension_semantics = [], scalar_prefetch = 0 : i64, scratch_operands = 0 : i64, tpu.core_type = #tpu.core_type<tc>} {
    %c0 = arith.constant 0 : index
    %c0_0 = arith.constant 0 : index
    %0 = vector.load %arg0[%c0, %c0_0] : memref<2x32xf32, #tpu.memory_space<vmem>>, vector<2x32xf32>
    %1 = arith.negf %0 : vector<2x32xf32>
    %2 = math.exp %1 : vector<2x32xf32>
    %cst = arith.constant 1.000000e+00 : f32
    %3 = vector.broadcast %cst : f32 to vector<2x32xf32>
    %4 = arith.addf %3, %2 : vector<2x32xf32>
    %5 = arith.divf %3, %4 : vector<2x32xf32>
    %6 = arith.mulf %0, %5 : vector<2x32xf32>
    %c0_1 = arith.constant 0 : index
    %c0_2 = arith.constant 0 : index
    %7 = vector.load %arg1[%c0_1, %c0_2] : memref<32x64xf32, #tpu.memory_space<vmem>>, vector<32x64xf32>
    %cst_3 = arith.constant dense<0.000000e+00> : vector<2x64xf32>
    %8 = tpu.matmul %6, %7, %cst_3 {dimension_numbers = #tpu.dot_dimension_numbers<[1], [0], [0], [1], [0, 0, 1, 1], [], []>} : vector<2x32xf32>, vector<32x64xf32>, vector<2x64xf32> -> vector<2x64xf32>
    %c0_4 = arith.constant 0 : index
    %c0_5 = arith.constant 0 : index
    %9 = vector.load %arg2[%c0_4, %c0_5] : memref<1x64xf32, #tpu.memory_space<vmem>>, vector<1x64xf32>
    %10 = vector.broadcast %9 : vector<1x64xf32> to vector<2x64xf32>
    %11 = arith.addf %8, %10 : vector<2x64xf32>
    %c0_6 = arith.constant 0 : index
    %c0_7 = arith.constant 0 : index
    %12 = vector.load %arg3[%c0_6, %c0_7] : memref<2x64xf32, #tpu.memory_space<vmem>>, vector<2x64xf32>
    tpu.vector_store %arg3[%c0_6, %c0_7], %11 {strides = array<i32>} : memref<2x64xf32, #tpu.memory_space<vmem>>, vector<2x64xf32>,
    return
  }
}

</mosaic_0001>

<bundles_post_ra>
// kernel: tpu_custom_call.1
= control target key start
LH: loop header
LB: loop body
LE: loop exit
PB: predicated region body
PF: predicated region fallthrough
CT: control target
= control target key end

     0   :  { %8 = vsyncpa [#allocation3], 0  ;;  %s335_s0 = inlined_call_operand.hbm [shape: f32[2,32], index: 0, kind: input, shape index: {}]   ;;  %s336_s1 = inlined_call_operand.hbm [shape: f32[32,64], index: 1, kind: input, shape index: {}]   ;;  %s337_s2 = inlined_call_operand.vmem [shape: f32[1,64], index: 2, kind: input, shape index: {}]   ;;  %s338_s3 = inlined_call_operand.hbm [shape: f32[2,64], index: 3, kind: output, shape index: {}]  }
   0x1   :  { %9 = vsyncpa [#allocation6], 0 }
   0x2   :  { %10 = vsyncpa [#allocation4], 0  ;;  %s261_s12 = smov [#allocation2]   ;;  %s262_s14 = smov [#allocation5]  }
   0x3   :  { %s17_s13 = sshll.u32 %s261_s12, 4  ;;  %s26_s15 = sshll.u32 %s262_s14, 4  ;;  %s18_s13 = int_to_ptr.vmem [resolvable:$true] %s17_s13  ;;  %s289_s15 = int_to_ptr.vmem [resolvable:$true] %s26_s15 }
   0x4   :  { %s189_s18 = scalar_lea.hbm %s335_s0, 32 }
   0x5   :  { %p190_p0 = scmp.ne.s32.totalorder %s335_s0, %s189_s18  ;;  %p193_p1 = scmp.lt.u32.totalorder %s189_s18, %s335_s0 }
   0x7   :  { %p195_p2 = pnand %p193_p1, %p190_p0 }
   0x9   :  { %198 = shalt.err (!%p195_p2)
}
   0xa   :  { %s199_s23 = scalar_lea.vmem %s18_s13, 32  ;;  %p204_p4 = scmp.lt.s32.totalorder %s18_s13, %s18_s13 }
   0xb   :  { %p200_p3 = scmp.ne.s32.totalorder %s18_s13, %s199_s23  ;;  %p205_p5 = scmp.lt.s32.totalorder %s199_s23, %s199_s23 }
   0xd   :  { %p206_p6 = por %p205_p5, %p204_p4 }
   0xf   :  { %p207_p7 = pnand %p206_p6, %p200_p3 }
  0x11   :  { %210 = shalt.err (!%p207_p7)
}
  0x12   :  { %20 = dma.hbm_to_vmem [thread:$0]  %s335_s0, 32, %s18_s13, [#allocation3]  }
  0x13   :  { %s211_s28 = scalar_lea.hbm %s336_s1, 512 }
  0x14   :  { %p212_p8 = scmp.ne.s32.totalorder %s336_s1, %s211_s28  ;;  %p215_p9 = scmp.lt.u32.totalorder %s211_s28, %s336_s1 }
  0x16   :  { %p217_p10 = pnand %p215_p9, %p212_p8 }
  0x18   :  { %220 = shalt.err (!%p217_p10)
}
  0x19   :  { %s221_s6 = scalar_lea.vmem %s289_s15, 512  ;;  %p226_p12 = scmp.lt.s32.totalorder %s289_s15, %s289_s15 }
  0x1a   :  { %p222_p11 = scmp.ne.s32.totalorder %s289_s15, %s221_s6  ;;  %p227_p13 = scmp.lt.s32.totalorder %s221_s6, %s221_s6 }
  0x1c   :  { %p228_p0 = por %p227_p13, %p226_p12 }
  0x1e   :  { %p229_p1 = pnand %p228_p0, %p222_p11 }
  0x20   :  { %232 = shalt.err (!%p229_p1)
}
  0x21   :  { %s263_s0 = smov 128   ;;  %s264_s7 = smov 8  }
  0x22   :  { %32 = dma.hbm_to_vmem [thread:$0]  %s336_s1, 512, %s289_s15, [#allocation6], %s263_s0, %s263_s0, %s264_s7  }
  0x23   :  { %255 = dma.done.wait [#allocation3], 32  }
  0x24   :  { %256 = vsyncadd [#allocation3], 4294967264 }
  0x25   :  { %257 = dma.done.wait [#allocation6], 512  }
  0x26   :  { %258 = vsyncadd [#allocation6], 4294966784  ;;  %v265_v0 = vmov 0.0|0.0   ;;  %vm266_vm0 = vmmov 0   ;;  %v267_v1 = vmov 0.0   ;;  %v49_v2 = vld [vmem:[#allocation5] sm:$0xff] }
  0x27   :  { %171 = vmatprep.subr.bf16.mxu0 %v265_v0  ;;  %168 = vmatprep.mubr.msk.f32.mxu0 %vm266_vm0, %v267_v1  ;;  %v50_v3 = vld [vmem:[#allocation5 + $0x8] sm:$0xff]  ;;  %v51_v4 = vld [vmem:[#allocation5 + $0x10] sm:$0xff]  ;;  %v52_v6 = vld [vmem:[#allocation5 + $0x18] sm:$0xff]  ;;  %vm60_vm1 = vcmask 261120   ;;  %s268_s11 = smov [#allocation7]   ;;  %vm134_vm2 = vcmask 517120  }
  0x28   :  { %v172_v5 = vpack.c.bf16 %v50_v3, %v49_v2  ;;  %v41_v7 = vld [vmem:[#allocation2] sm:$0x3]  ;;  %v175_v9 = vpack.c.bf16 %v52_v6, %v51_v4  ;;  %s142_s12 = sshll.u32 %s268_s11, 4  ;;  %s143_s12 = int_to_ptr.vmem [resolvable:$true] %s142_s12 }
  0x29   :  { %v152_v8 = vmul.f32 -1.442695, %v41_v7  ;;  %v153_v14 = vld [vmem:[%s337_s2] ss:$0 sm:$0xff]  ;;  %s233_s13 = scalar_lea.vmem %s143_s12, 32  ;;  %p238_p3 = scmp.lt.s32.totalorder %s143_s12, %s143_s12 }
  0x2a   :  { %173 = vmatpush3.bf16.msra.mxu0 %v172_v5  ;;  %p234_p2 = scmp.ne.s32.totalorder %s143_s12, %s233_s13  ;;  %p239_p4 = scmp.lt.s32.totalorder %s233_s13, %s233_s13 }
  0x2b   :  { %174 = vmatprep.subr.bf16.mxu0 %v265_v0  ;;  %185 = vpow2.f32 %v152_v8 }
  0x2c   :  { %p240_p5 = por %p239_p4, %p238_p3 }
  0x2e   :  { %176 = vmatpush3.bf16.msra.mxu0 %v175_v9  ;;  %p241_p6 = pnand %p240_p5, %p234_p2 }
  0x35   :  { %v186_v10 = vpop.eup %185 }
  0x36   :  { %v45_v11 = vadd.f32 1.0, %v186_v10 }
  0x38   :  { %187 = vrcp.f32 %v45_v11 }
  0x42   :  { %v188_v12 = vpop.eup %187 }
  0x43   :  { %v48_v13 = vmul.f32 %v188_v12, %v41_v7 }
  0x45   :  { %169 = vmatmul.mubr.msk.f32.vlgmr.msra.gmra.mrb[0].mxu0 %vm60_vm1, %v48_v13 }
 0x118   :  { %v130_v15 = vpop.f32.mrb[0].mxu0 }
 0x119   :  { %v131_v16 = vadd.f32 %v153_v14, %v130_v15  ;;  %v170_v17 = vpop.f32.mrb[1].mxu0 }
 0x11b   :  { %135 = vst.msk [vmem:[#allocation7] sm:$0x3] %vm134_vm2, %v131_v16 }
 0x11c   :  { %244 = shalt.err (!%p241_p6)
}
 0x11d   :  { %s245_s16 = scalar_lea.hbm %s338_s3, 32 }
 0x11e   :  { %p246_p7 = scmp.ne.s32.totalorder %s338_s3, %s245_s16  ;;  %p249_p8 = scmp.lt.u32.totalorder %s245_s16, %s338_s3 }
 0x120   :  { %p251_p9 = pnand %p249_p8, %p246_p7 }
 0x122   :  { %254 = shalt.err (!%p251_p9)
}
 0x123   :  { %145 = dma.vmem_to_hbm [thread:$0]  %s143_s12, 32, %s338_s3, [#allocation4]  }
 0x124   :  { %259 = dma.done.wait [#allocation4], 32  }
 0x125   :  { %260 = vsyncadd [#allocation4], 4294967264 }
 0x126   :  { %149 = vsyncpa [#allocation3], 1 }
 0x127   :  { %150 = vsyncpa [#allocation6], 1 }
 0x128   :  { %151 = vsyncpa [#allocation4], 1 }

</bundles_post_ra>
